<compile_context>
chip_gen: v6e
topology: v6e:2x2x1
jax: 0.10.0
libtpu: 0.0.40
codegen_flags: <defaults>
</compile_context>

<pallas_src>
import functools
import math

import jax
import jax.numpy as jnp
from jax.experimental import pallas as pl
from jax.experimental.pallas import tpu as pltpu


# ---------------------------------------------------------------------------
# Fused kernel: wavefront-packed L-layer tanh-RNN recurrence + flatten + ReLU
# + Linear, all in one call.
#   packed h_s = tanh( xproj[s] + packed h_{s-1} @ W_block )
#   acc       += relu(packed h_s) @ fc_w_block[t]      (t = s - (L-1))
#   out        = acc + fc_b
# ---------------------------------------------------------------------------
def fused_rnn_fc_kernel(x_ref, w_in_ref, w_blk_ref, fc_w_ref, fc_b_ref, out_ref,
                        *, seq_len, num_layers, batch, hidden):
    T, L, B, H = seq_len, num_layers, batch, hidden
    LH = L * H
    S = T + L - 1                      # number of wavefront steps

    # Hoisted input projection for ALL wavefront steps in one matmul.
    # x_aug rows are [x_t | step-indicators]; w_in_aug = [[w_ih0^T | 0]; bias
    # rows], so xproj[s*B:(s+1)*B] is exactly the per-step additive term
    # (layer-0 input projection + per-layer biases, gated off while a layer is
    # not yet active in the wavefront).
    xproj = jnp.dot(x_ref[...], w_in_ref[...],
                    preferred_element_type=jnp.float32)          # (S*B, L*H)

    w_blk = w_blk_ref[...]                                       # (L*H, L*H)

    h = jnp.zeros((B, LH), dtype=jnp.float32)                    # [h^0 | ... | h^{L-1}]
    acc = jnp.zeros((B, out_ref.shape[1]), dtype=jnp.float32)    # FC accumulator

    # Wavefront over (time, layer): at step s, layer l handles t = s - l.
    # T=8, L=2 -> 9 steps; tiny, so fully unrolled (static Python loop).
    for s in range(S):
        pre = xproj[s * B:(s + 1) * B, :] + jnp.dot(
            h, w_blk, preferred_element_type=jnp.float32)
        h = jnp.tanh(pre)

        t = s - (L - 1)                # timestep the LAST layer just produced
        if 0 <= t < T:
            # Flatten + ReLU + Linear, accumulated per timestep.  The FC weight
            # slice has zero rows for the non-last-layer blocks, so the full
            # packed h is used directly (no lane slicing / concat); these
            # matmuls are off the recurrence critical path.
            acc = acc + jnp.dot(jnp.maximum(h, 0.0),
                                fc_w_ref[pl.ds(t * LH, LH), :],
                                preferred_element_type=jnp.float32)

    out_ref[...] = (acc + fc_b_ref[...]).astype(out_ref.dtype)


# ---------------------------------------------------------------------------
# Wrapper: one pallas_call for the whole forward pass.
# ---------------------------------------------------------------------------
def rnn_forward(x, params, *, num_classes):
    B, T, D = x.shape
    L = params["num_layers"]
    H = params["hidden_size"]
    C_pad = params["fc_w"].shape[1]
    B_pad = ((max(B, 8) + 7) // 8) * 8          # 8-sublane aligned batch
    S = T + L - 1

    # --- layout glue (wrapper-side XLA on tiny arrays, negligible) ----------
    xt = jnp.transpose(x, (1, 0, 2))                              # (T, B, D) time-major
    xt = jnp.pad(xt, ((0, L - 1), (0, B_pad - B), (0, 0)))        # zero batch rows +
    x_flat = xt.reshape(S * B_pad, D)                             # (L-1) tail wavefront steps
    # Indicator column l == 1 iff wavefront step s >= l (gates layer-l bias).
    ind = (jnp.arange(S)[:, None] >= jnp.arange(L)[None, :]).astype(x.dtype)   # (S, L)
    ind = jnp.broadcast_to(ind[:, None, :], (S, B_pad, L)).reshape(S * B_pad, L)
    x_aug = jnp.concatenate([x_flat, ind], axis=1)                # (S*B_pad, D+L)

    kernel = functools.partial(fused_rnn_fc_kernel, seq_len=T, num_layers=L,
                               batch=B_pad, hidden=H)
    out_pad = pl.pallas_call(
        kernel,
        out_shape=jax.ShapeDtypeStruct((B_pad, C_pad), jnp.float32),
        in_specs=[pl.BlockSpec(memory_space=pltpu.MemorySpace.VMEM)] * 5,
        out_specs=pl.BlockSpec(memory_space=pltpu.MemorySpace.VMEM),
    )(x_aug, params["w_in"], params["w_blk"], params["fc_w"], params["fc_b"])

    # Slice padded batch rows and lane-padded classes back off (free glue).
    return out_pad[:B, :num_classes]


def init_params(key, input_size, hidden_size, num_layers, num_classes, seq_len):
    """PyTorch-style U(-1/sqrt(fan), 1/sqrt(fan)) init, stored in the packed
    kernel layout (block recurrence matrix, indicator-gated bias rows,
    zero-row-expanded + lane-padded FC weight)."""
    D, H, L, T = input_size, hidden_size, num_layers, seq_len
    LH = L * H
    k = 1.0 / math.sqrt(H)

    w_ih, w_hh, bias = [], [], []
    for layer in range(L):
        d_in = D if layer == 0 else H
        key, k1, k2, k3, k4 = jax.random.split(key, 5)
        w_ih.append(jax.random.uniform(k1, (H, d_in), jnp.float32, -k, k))
        w_hh.append(jax.random.uniform(k2, (H, H), jnp.float32, -k, k))
        b_ih = jax.random.uniform(k3, (H,), jnp.float32, -k, k)
        b_hh = jax.random.uniform(k4, (H,), jnp.float32, -k, k)
        bias.append(b_ih + b_hh)

    # Hoisted-input-projection matrix (D+L, L*H):
    #   rows [0:D]  -> w_ih0^T into block 0 (upper layers get their inputs via
    #                  the recurrence block matrix instead)
    #   row  D + l  -> combined bias of layer l in block l, multiplied by the
    #                  step-indicator column so not-yet-active layers see 0.
    w_in = jnp.zeros((D + L, LH), jnp.float32)
    w_in = w_in.at[:D, :H].set(w_ih[0].T)
    for l in range(L):
        w_in = w_in.at[D + l, l * H:(l + 1) * H].set(bias[l])

    # Block-packed recurrence matrix (L*H, L*H):
    #   block [l, l]   = w_hh_l^T   (same-layer recurrence)
    #   block [l-1, l] = w_ih_l^T   (lower-layer output -> this layer's input)
    #   zero elsewhere (kills illegal upper->lower paths).
    w_blk = jnp.zeros((LH, LH), jnp.float32)
    for l in range(L):
        w_blk = w_blk.at[l * H:(l + 1) * H, l * H:(l + 1) * H].set(w_hh[l].T)
        if l > 0:
            w_blk = w_blk.at[(l - 1) * H:l * H, l * H:(l + 1) * H].set(w_ih[l].T)

    # FC = Linear(H*T, C) over the (t, h)-ordered flatten.  Stored transposed,
    # lane-padded to a 128-wide output, and expanded with zero rows for the
    # non-last-layer blocks so the kernel can feed the FULL packed h.
    fc_in = H * T
    kf = 1.0 / math.sqrt(fc_in)
    key, k5, k6 = jax.random.split(key, 3)
    fc_w = jax.random.uniform(k5, (num_classes, fc_in), jnp.float32, -kf, kf)
    fc_b = jax.random.uniform(k6, (num_classes,), jnp.float32, -kf, kf)
    c_pad = ((num_classes + 127) // 128) * 128
    fc_w_t = jnp.pad(fc_w.T, ((0, 0), (0, c_pad - num_classes)))      # (T*H, C_pad)
    fc_big = jnp.zeros((T, L, H, c_pad), jnp.float32)
    fc_big = fc_big.at[:, L - 1, :, :].set(fc_w_t.reshape(T, H, c_pad))
    fc_big = fc_big.reshape(T * LH, c_pad)                            # (T*L*H, C_pad)

    return {
        "num_layers": L,
        "hidden_size": H,
        "w_in": w_in,                                                 # (D+L, L*H)
        "w_blk": w_blk,                                               # (L*H, L*H)
        "fc_w": fc_big,                                               # (T*L*H, C_pad)
        "fc_b": jnp.pad(fc_b, (0, c_pad - num_classes)).reshape(1, c_pad),
    }


if __name__ == "__main__":
    # Small, forward-consistent shapes (batch_first RNN).
    B, T = 2, 8                 # batch, sequence_len
    input_size = 16
    hidden_size = 32
    num_layers = 2
    num_classes = 10

    key = jax.random.PRNGKey(0)
    key, xk = jax.random.split(key)
    x = jax.random.normal(xk, (B, T, input_size), dtype=jnp.float32)

    params = init_params(key, input_size, hidden_size, num_layers,
                         num_classes, T)

    out = rnn_forward(x, params, num_classes=num_classes)
    jax.block_until_ready(out)
    assert out.shape == (B, num_classes)
    print("KERNEL_OK")
</pallas_src>

<mosaic_0001>
module attributes {stable_mosaic.version = 11 : i64} {
  func.func @fused_rnn_fc_kernel(%arg0: memref<72x18xf32, #tpu.memory_space<vmem>>, %arg1: memref<18x64xf32, #tpu.memory_space<vmem>>, %arg2: memref<64x64xf32, #tpu.memory_space<vmem>>, %arg3: memref<512x128xf32, #tpu.memory_space<vmem>>, %arg4: memref<1x128xf32, #tpu.memory_space<vmem>>, %arg5: memref<8x128xf32, #tpu.memory_space<vmem>>) attributes {dimension_semantics = [], scalar_prefetch = 0 : i64, scratch_operands = 0 : i64, tpu.core_type = #tpu.core_type<tc>} {
    %c0 = arith.constant 0 : index
    %c0_0 = arith.constant 0 : index
    %0 = vector.load %arg0[%c0, %c0_0] : memref<72x18xf32, #tpu.memory_space<vmem>>, vector<72x18xf32>
    %c0_1 = arith.constant 0 : index
    %c0_2 = arith.constant 0 : index
    %1 = vector.load %arg1[%c0_1, %c0_2] : memref<18x64xf32, #tpu.memory_space<vmem>>, vector<18x64xf32>
    %cst = arith.constant dense<0.000000e+00> : vector<72x64xf32>
    %2 = tpu.matmul %0, %1, %cst {dimension_numbers = #tpu.dot_dimension_numbers<[1], [0], [0], [1], [0, 0, 1, 1], [], []>} : vector<72x18xf32>, vector<18x64xf32>, vector<72x64xf32> -> vector<72x64xf32>
    %c0_3 = arith.constant 0 : index
    %c0_4 = arith.constant 0 : index
    %3 = vector.load %arg2[%c0_3, %c0_4] : memref<64x64xf32, #tpu.memory_space<vmem>>, vector<64x64xf32>
    %cst_5 = arith.constant 0.000000e+00 : f32
    %4 = vector.broadcast %cst_5 : f32 to vector<8x64xf32>
    %cst_6 = arith.constant 0.000000e+00 : f32
    %5 = vector.broadcast %cst_6 : f32 to vector<8x128xf32>
    %6 = vector.extract_strided_slice %2 {offsets = [0, 0], sizes = [8, 64], strides = [1, 1]} : vector<72x64xf32> to vector<8x64xf32>
    %cst_7 = arith.constant dense<0.000000e+00> : vector<8x64xf32>
    %7 = tpu.matmul %4, %3, %cst_7 {dimension_numbers = #tpu.dot_dimension_numbers<[1], [0], [0], [1], [0, 0, 1, 1], [], []>} : vector<8x64xf32>, vector<64x64xf32>, vector<8x64xf32> -> vector<8x64xf32>
    %8 = arith.addf %6, %7 : vector<8x64xf32>
    %9 = math.tanh %8 : vector<8x64xf32>
    %10 = vector.extract_strided_slice %2 {offsets = [8, 0], sizes = [8, 64], strides = [1, 1]} : vector<72x64xf32> to vector<8x64xf32>
    %cst_8 = arith.constant dense<0.000000e+00> : vector<8x64xf32>
    %11 = tpu.matmul %9, %3, %cst_8 {dimension_numbers = #tpu.dot_dimension_numbers<[1], [0], [0], [1], [0, 0, 1, 1], [], []>} : vector<8x64xf32>, vector<64x64xf32>, vector<8x64xf32> -> vector<8x64xf32>
    %12 = arith.addf %10, %11 : vector<8x64xf32>
    %13 = math.tanh %12 : vector<8x64xf32>
    %cst_9 = arith.constant 0.000000e+00 : f32
    %14 = vector.broadcast %cst_9 : f32 to vector<8x64xf32>
    %15 = arith.maximumf %13, %14 : vector<8x64xf32>
    %c0_10 = arith.constant 0 : index
    %c0_11 = arith.constant 0 : index
    %16 = vector.load %arg3[%c0_10, %c0_11] : memref<512x128xf32, #tpu.memory_space<vmem>>, vector<64x128xf32>
    %cst_12 = arith.constant dense<0.000000e+00> : vector<8x128xf32>
    %17 = tpu.matmul %15, %16, %cst_12 {dimension_numbers = #tpu.dot_dimension_numbers<[1], [0], [0], [1], [0, 0, 1, 1], [], []>} : vector<8x64xf32>, vector<64x128xf32>, vector<8x128xf32> -> vector<8x128xf32>
    %18 = arith.addf %5, %17 : vector<8x128xf32>
    %19 = vector.extract_strided_slice %2 {offsets = [16, 0], sizes = [8, 64], strides = [1, 1]} : vector<72x64xf32> to vector<8x64xf32>
    %cst_13 = arith.constant dense<0.000000e+00> : vector<8x64xf32>
    %20 = tpu.matmul %13, %3, %cst_13 {dimension_numbers = #tpu.dot_dimension_numbers<[1], [0], [0], [1], [0, 0, 1, 1], [], []>} : vector<8x64xf32>, vector<64x64xf32>, vector<8x64xf32> -> vector<8x64xf32>
    %21 = arith.addf %19, %20 : vector<8x64xf32>
    %22 = math.tanh %21 : vector<8x64xf32>
    %cst_14 = arith.constant 0.000000e+00 : f32
    %23 = vector.broadcast %cst_14 : f32 to vector<8x64xf32>
    %24 = arith.maximumf %22, %23 : vector<8x64xf32>
    %c64 = arith.constant 64 : index
    %c0_15 = arith.constant 0 : index
    %25 = vector.load %arg3[%c64, %c0_15] : memref<512x128xf32, #tpu.memory_space<vmem>>, vector<64x128xf32>
    %cst_16 = arith.constant dense<0.000000e+00> : vector<8x128xf32>
    %26 = tpu.matmul %24, %25, %cst_16 {dimension_numbers = #tpu.dot_dimension_numbers<[1], [0], [0], [1], [0, 0, 1, 1], [], []>} : vector<8x64xf32>, vector<64x128xf32>, vector<8x128xf32> -> vector<8x128xf32>
    %27 = arith.addf %18, %26 : vector<8x128xf32>
    %28 = vector.extract_strided_slice %2 {offsets = [24, 0], sizes = [8, 64], strides = [1, 1]} : vector<72x64xf32> to vector<8x64xf32>
    %cst_17 = arith.constant dense<0.000000e+00> : vector<8x64xf32>
    %29 = tpu.matmul %22, %3, %cst_17 {dimension_numbers = #tpu.dot_dimension_numbers<[1], [0], [0], [1], [0, 0, 1, 1], [], []>} : vector<8x64xf32>, vector<64x64xf32>, vector<8x64xf32> -> vector<8x64xf32>
    %30 = arith.addf %28, %29 : vector<8x64xf32>
    %31 = math.tanh %30 : vector<8x64xf32>
    %cst_18 = arith.constant 0.000000e+00 : f32
    %32 = vector.broadcast %cst_18 : f32 to vector<8x64xf32>
    %33 = arith.maximumf %31, %32 : vector<8x64xf32>
    %c128 = arith.constant 128 : index
    %c0_19 = arith.constant 0 : index
    %34 = vector.load %arg3[%c128, %c0_19] : memref<512x128xf32, #tpu.memory_space<vmem>>, vector<64x128xf32>
    %cst_20 = arith.constant dense<0.000000e+00> : vector<8x128xf32>
    %35 = tpu.matmul %33, %34, %cst_20 {dimension_numbers = #tpu.dot_dimension_numbers<[1], [0], [0], [1], [0, 0, 1, 1], [], []>} : vector<8x64xf32>, vector<64x128xf32>, vector<8x128xf32> -> vector<8x128xf32>
    %36 = arith.addf %27, %35 : vector<8x128xf32>
    %37 = vector.extract_strided_slice %2 {offsets = [32, 0], sizes = [8, 64], strides = [1, 1]} : vector<72x64xf32> to vector<8x64xf32>
    %cst_21 = arith.constant dense<0.000000e+00> : vector<8x64xf32>
    %38 = tpu.matmul %31, %3, %cst_21 {dimension_numbers = #tpu.dot_dimension_numbers<[1], [0], [0], [1], [0, 0, 1, 1], [], []>} : vector<8x64xf32>, vector<64x64xf32>, vector<8x64xf32> -> vector<8x64xf32>
    %39 = arith.addf %37, %38 : vector<8x64xf32>
    %40 = math.tanh %39 : vector<8x64xf32>
    %cst_22 = arith.constant 0.000000e+00 : f32
    %41 = vector.broadcast %cst_22 : f32 to vector<8x64xf32>
    %42 = arith.maximumf %40, %41 : vector<8x64xf32>
    %c192 = arith.constant 192 : index
    %c0_23 = arith.constant 0 : index
    %43 = vector.load %arg3[%c192, %c0_23] : memref<512x128xf32, #tpu.memory_space<vmem>>, vector<64x128xf32>
    %cst_24 = arith.constant dense<0.000000e+00> : vector<8x128xf32>
    %44 = tpu.matmul %42, %43, %cst_24 {dimension_numbers = #tpu.dot_dimension_numbers<[1], [0], [0], [1], [0, 0, 1, 1], [], []>} : vector<8x64xf32>, vector<64x128xf32>, vector<8x128xf32> -> vector<8x128xf32>
    %45 = arith.addf %36, %44 : vector<8x128xf32>
    %46 = vector.extract_strided_slice %2 {offsets = [40, 0], sizes = [8, 64], strides = [1, 1]} : vector<72x64xf32> to vector<8x64xf32>
    %cst_25 = arith.constant dense<0.000000e+00> : vector<8x64xf32>
    %47 = tpu.matmul %40, %3, %cst_25 {dimension_numbers = #tpu.dot_dimension_numbers<[1], [0], [0], [1], [0, 0, 1, 1], [], []>} : vector<8x64xf32>, vector<64x64xf32>, vector<8x64xf32> -> vector<8x64xf32>
    %48 = arith.addf %46, %47 : vector<8x64xf32>
    %49 = math.tanh %48 : vector<8x64xf32>
    %cst_26 = arith.constant 0.000000e+00 : f32
    %50 = vector.broadcast %cst_26 : f32 to vector<8x64xf32>
    %51 = arith.maximumf %49, %50 : vector<8x64xf32>
    %c256 = arith.constant 256 : index
    %c0_27 = arith.constant 0 : index
    %52 = vector.load %arg3[%c256, %c0_27] : memref<512x128xf32, #tpu.memory_space<vmem>>, vector<64x128xf32>
    %cst_28 = arith.constant dense<0.000000e+00> : vector<8x128xf32>
    %53 = tpu.matmul %51, %52, %cst_28 {dimension_numbers = #tpu.dot_dimension_numbers<[1], [0], [0], [1], [0, 0, 1, 1], [], []>} : vector<8x64xf32>, vector<64x128xf32>, vector<8x128xf32> -> vector<8x128xf32>
    %54 = arith.addf %45, %53 : vector<8x128xf32>
    %55 = vector.extract_strided_slice %2 {offsets = [48, 0], sizes = [8, 64], strides = [1, 1]} : vector<72x64xf32> to vector<8x64xf32>
    %cst_29 = arith.constant dense<0.000000e+00> : vector<8x64xf32>
    %56 = tpu.matmul %49, %3, %cst_29 {dimension_numbers = #tpu.dot_dimension_numbers<[1], [0], [0], [1], [0, 0, 1, 1], [], []>} : vector<8x64xf32>, vector<64x64xf32>, vector<8x64xf32> -> vector<8x64xf32>
    %57 = arith.addf %55, %56 : vector<8x64xf32>
    %58 = math.tanh %57 : vector<8x64xf32>
    %cst_30 = arith.constant 0.000000e+00 : f32
    %59 = vector.broadcast %cst_30 : f32 to vector<8x64xf32>
    %60 = arith.maximumf %58, %59 : vector<8x64xf32>
    %c320 = arith.constant 320 : index
    %c0_31 = arith.constant 0 : index
    %61 = vector.load %arg3[%c320, %c0_31] : memref<512x128xf32, #tpu.memory_space<vmem>>, vector<64x128xf32>
    %cst_32 = arith.constant dense<0.000000e+00> : vector<8x128xf32>
    %62 = tpu.matmul %60, %61, %cst_32 {dimension_numbers = #tpu.dot_dimension_numbers<[1], [0], [0], [1], [0, 0, 1, 1], [], []>} : vector<8x64xf32>, vector<64x128xf32>, vector<8x128xf32> -> vector<8x128xf32>
    %63 = arith.addf %54, %62 : vector<8x128xf32>
    %64 = vector.extract_strided_slice %2 {offsets = [56, 0], sizes = [8, 64], strides = [1, 1]} : vector<72x64xf32> to vector<8x64xf32>
    %cst_33 = arith.constant dense<0.000000e+00> : vector<8x64xf32>
    %65 = tpu.matmul %58, %3, %cst_33 {dimension_numbers = #tpu.dot_dimension_numbers<[1], [0], [0], [1], [0, 0, 1, 1], [], []>} : vector<8x64xf32>, vector<64x64xf32>, vector<8x64xf32> -> vector<8x64xf32>
    %66 = arith.addf %64, %65 : vector<8x64xf32>
    %67 = math.tanh %66 : vector<8x64xf32>
    %cst_34 = arith.constant 0.000000e+00 : f32
    %68 = vector.broadcast %cst_34 : f32 to vector<8x64xf32>
    %69 = arith.maximumf %67, %68 : vector<8x64xf32>
    %c384 = arith.constant 384 : index
    %c0_35 = arith.constant 0 : index
    %70 = vector.load %arg3[%c384, %c0_35] : memref<512x128xf32, #tpu.memory_space<vmem>>, vector<64x128xf32>
    %cst_36 = arith.constant dense<0.000000e+00> : vector<8x128xf32>
    %71 = tpu.matmul %69, %70, %cst_36 {dimension_numbers = #tpu.dot_dimension_numbers<[1], [0], [0], [1], [0, 0, 1, 1], [], []>} : vector<8x64xf32>, vector<64x128xf32>, vector<8x128xf32> -> vector<8x128xf32>
    %72 = arith.addf %63, %71 : vector<8x128xf32>
    %73 = vector.extract_strided_slice %2 {offsets = [64, 0], sizes = [8, 64], strides = [1, 1]} : vector<72x64xf32> to vector<8x64xf32>
    %cst_37 = arith.constant dense<0.000000e+00> : vector<8x64xf32>
    %74 = tpu.matmul %67, %3, %cst_37 {dimension_numbers = #tpu.dot_dimension_numbers<[1], [0], [0], [1], [0, 0, 1, 1], [], []>} : vector<8x64xf32>, vector<64x64xf32>, vector<8x64xf32> -> vector<8x64xf32>
    %75 = arith.addf %73, %74 : vector<8x64xf32>
    %76 = math.tanh %75 : vector<8x64xf32>
    %cst_38 = arith.constant 0.000000e+00 : f32
    %77 = vector.broadcast %cst_38 : f32 to vector<8x64xf32>
    %78 = arith.maximumf %76, %77 : vector<8x64xf32>
    %c448 = arith.constant 448 : index
    %c0_39 = arith.constant 0 : index
    %79 = vector.load %arg3[%c448, %c0_39] : memref<512x128xf32, #tpu.memory_space<vmem>>, vector<64x128xf32>
    %cst_40 = arith.constant dense<0.000000e+00> : vector<8x128xf32>
    %80 = tpu.matmul %78, %79, %cst_40 {dimension_numbers = #tpu.dot_dimension_numbers<[1], [0], [0], [1], [0, 0, 1, 1], [], []>} : vector<8x64xf32>, vector<64x128xf32>, vector<8x128xf32> -> vector<8x128xf32>
    %81 = arith.addf %72, %80 : vector<8x128xf32>
    %c0_41 = arith.constant 0 : index
    %c0_42 = arith.constant 0 : index
    %82 = vector.load %arg4[%c0_41, %c0_42] : memref<1x128xf32, #tpu.memory_space<vmem>>, vector<1x128xf32>
    %83 = vector.broadcast %82 : vector<1x128xf32> to vector<8x128xf32>
    %84 = arith.addf %81, %83 : vector<8x128xf32>
    %c0_43 = arith.constant 0 : index
    %c0_44 = arith.constant 0 : index
    %85 = vector.load %arg5[%c0_43, %c0_44] : memref<8x128xf32, #tpu.memory_space<vmem>>, vector<8x128xf32>
    tpu.vector_store %arg5[%c0_43, %c0_44], %84 {strides = array<i32>} : memref<8x128xf32, #tpu.memory_space<vmem>>, vector<8x128xf32>,
    return
  }
}

</mosaic_0001>

<bundles_post_ra>
// kernel: tpu_custom_call.1
= control target key start
LH: loop header
LB: loop body
LE: loop exit
PB: predicated region body
PF: predicated region fallthrough
CT: control target
= control target key end

     0   :  { %10 = vsyncpa [#allocation3], 0  ;;  %s2609_s0 = inlined_call_operand.vmem [shape: f32[72,18], index: 0, kind: input, shape index: {}]   ;;  %s2610_s1 = inlined_call_operand.vmem [shape: f32[18,64], index: 1, kind: input, shape index: {}]   ;;  %s2611_s2 = inlined_call_operand.vmem [shape: f32[64,64], index: 2, kind: input, shape index: {}]   ;;  %s2612_s3 = inlined_call_operand.hbm [shape: f32[512,128], index: 3, kind: input, shape index: {}]   ;;  %s2613_s4 = inlined_call_operand.vmem [shape: f32[1,128], index: 4, kind: input, shape index: {}]   ;;  %s2614_s5 = inlined_call_operand.hbm [shape: f32[8,128], index: 5, kind: output, shape index: {}]  }
   0x1   :  { %11 = vsyncpa [#allocation4], 0  ;;  %s2175_s18 = smov [#allocation2]  }
   0x2   :  { %s23_s19 = sshll.u32 %s2175_s18, 4  ;;  %s24_s19 = int_to_ptr.vmem [resolvable:$true] %s23_s19 }
   0x3   :  { %s2139_s20 = scalar_lea.vmem %s24_s19, 8192  ;;  %p2144_p1 = scmp.lt.s32.totalorder %s24_s19, %s24_s19 }
   0x4   :  { %p2140_p0 = scmp.ne.s32.totalorder %s24_s19, %s2139_s20  ;;  %p2145_p2 = scmp.lt.s32.totalorder %s2139_s20, %s2139_s20 }
   0x6   :  { %p2146_p3 = por %p2145_p2, %p2144_p1 }
   0x8   :  { %p2147_p4 = pnand %p2146_p3, %p2140_p0 }
   0xa   :  { %2150 = shalt.err (!%p2147_p4)
}
   0xb   :  { %s2176_s21 = smov 128   ;;  %s2177_s22 = smov 8  }
   0xc   :  { %29 = dma.hbm_to_vmem [thread:$0]  %s2612_s3, 8192, %s24_s19, [#allocation3], %s2176_s21, %s2176_s21, %s2177_s22  }
   0xd   :  { %2171 = dma.done.wait [#allocation3], 8192  }
   0xe   :  { %2172 = vsyncadd [#allocation3], 4294959104  ;;  %v2178_v0 = vmov 0.0   ;;  %vm2179_vm0 = vmmov 0   ;;  %vm75_vm1 = vcmask 1041408   ;;  %v2223_v1 = vld [vmem:[%s2611_s2 + $0x38] sm:$0xff] }
   0xf   :  { %1784 = vmatprep.subr.mxu1 %v2178_v0  ;;  %1751 = vmatprep.subr.mxu0 %v2178_v0  ;;  %v2228_v2 = vld [vmem:[%s2611_s2 + $0x30] sm:$0xff]  ;;  %v2238_v4 = vld [vmem:[%s2611_s2 + $0x28] sm:$0xff]  ;;  %v44_v6 = vld [vmem:[%s2610_s1] sm:$0xff]  ;;  %vm47_vm2 = vcmask 146432   ;;  %vm197_vm3 = vcmask 523264   ;;  %s2180_s12 = smov [#allocation5]  }
  0x10   :  { %1757 = vmatprep.mubr.msk.f32.mxu0 %vm2179_vm0, %v2178_v0  ;;  %1800 = vmatprep.mubr.msk.f32.mxu1 %vm2179_vm0, %v2178_v0  ;;  %v46_v3 = vld [vmem:[%s2610_s1 + $0x10] sm:$0x3]  ;;  %v45_v5 = vld [vmem:[%s2610_s1 + $0x8] sm:$0xff]  ;;  %v2252_v7 = vld [vmem:[%s2611_s2 + $0x20] sm:$0xff]  ;;  %s1550_s13 = sshll.u32 %s2180_s12, 4  ;;  %s1551_s13 = int_to_ptr.vmem [resolvable:$true] %s1550_s13 }
  0x11   :  { %1785 = vmatpush3.msra.mxu1 %v2223_v1  ;;  %1752 = vmatpush3.msk.msra.mxu0 %vm75_vm1, %v46_v3  ;;  %v35_v8 = vld [vmem:[%s2609_s0] sm:$0xff]  ;;  %v2263_v9 = vld [vmem:[%s2611_s2 + $0x18] sm:$0xff]  ;;  %v2271_v10 = vld [vmem:[%s2611_s2 + $0x10] sm:$0xff]  ;;  %s2151_s14 = scalar_lea.vmem %s1551_s13, 128  ;;  %p2156_p6 = scmp.lt.s32.totalorder %s1551_s13, %s1551_s13 }
  0x12   :  { %1786 = vmatprep.subr.mxu1 %v2178_v0  ;;  %1753 = vmatprep.subr.mxu0 %v2178_v0  ;;  %v2281_v11 = vld [vmem:[%s2611_s2 + $0x8] sm:$0xff]  ;;  %v2290_v12 = vld [vmem:[%s2611_s2] sm:$0xff]  ;;  %v37_v14 = vld [vmem:[%s2609_s0 + $0x10] sm:$0xff]  ;;  %p2152_p5 = scmp.ne.s32.totalorder %s1551_s13, %s2151_s14  ;;  %p2157_p7 = scmp.lt.s32.totalorder %s2151_s14, %s2151_s14 }
  0x13   :  { %1787 = vmatpush3.msra.mxu1 %v2228_v2  ;;  %1754 = vmatpush3.msra.mxu0 %v45_v5  ;;  %v36_v13 = vld [vmem:[%s2609_s0 + $0x8] sm:$0xff]  ;;  %v38_v15 = vld [vmem:[%s2609_s0 + $0x18] sm:$0xff]  ;;  %v39_v16 = vld [vmem:[%s2609_s0 + $0x20] sm:$0xff] }
  0x14   :  { %1788 = vmatprep.subr.mxu1 %v2178_v0  ;;  %1755 = vmatprep.subr.mxu0 %v2178_v0  ;;  %v40_v17 = vld [vmem:[%s2609_s0 + $0x28] sm:$0xff]  ;;  %v41_v26 = vld [vmem:[%s2609_s0 + $0x30] sm:$0xff]  ;;  %v42_v27 = vld [vmem:[%s2609_s0 + $0x38] sm:$0xff]  ;;  %p2158_p8 = por %p2157_p7, %p2156_p6 }
  0x15   :  { %1789 = vmatpush3.msra.mxu1 %v2238_v4  ;;  %1756 = vmatpush3.msra.mxu0 %v44_v6  ;;  %v43_v28 = vld [vmem:[%s2609_s0 + $0x40] sm:$0xff]  ;;  %v356_v40 = vld [vmem:[#allocation2 + $0x38] sm:$0xff]  ;;  %v355_v42 = vld [vmem:[#allocation2 + $0x30] sm:$0xff] }
  0x16   :  { %1790 = vmatprep.subr.mxu1 %v2178_v0  ;;  %1758 = vmatmul.mubr.msk.f32.vlgmr.msra.gmra.mxu0 %vm47_vm2, %v35_v8  ;;  %v354_v43 = vld [vmem:[#allocation2 + $0x28] sm:$0xff]  ;;  %v353_v44 = vld [vmem:[#allocation2 + $0x20] sm:$0xff]  ;;  %v352_v45 = vld [vmem:[#allocation2 + $0x18] sm:$0xff]  ;;  %p2159_p9 = pnand %p2158_p8, %p2152_p5 }
  0x17   :  { %1791 = vmatpush3.msra.mxu1 %v2252_v7  ;;  %1760 = vmatprep.mubr.msk.f32.mxu0 %vm2179_vm0, %v2178_v0  ;;  %v351_v46 = vld [vmem:[#allocation2 + $0x10] sm:$0xff]  ;;  %v350_v47 = vld [vmem:[#allocation2 + $0x8] sm:$0xff]  ;;  %v349_v48 = vld [vmem:[#allocation2] sm:$0xff] }
  0x18   :  { %1792 = vmatprep.subr.mxu1 %v2178_v0  ;;  %1822 = vmatprep.subr.mxu0 %v2178_v0  ;;  %v440_v56 = vld [vmem:[#allocation2 + $0x78] sm:$0xff]  ;;  %v439_v57 = vld [vmem:[#allocation2 + $0x70] sm:$0xff]  ;;  %v438_v58 = vld [vmem:[#allocation2 + $0x68] sm:$0xff] }
  0x19   :  { %1793 = vmatpush3.msra.mxu1 %v2263_v9  ;;  %1823 = vmatpush3.msra.mxu0 %v2223_v1  ;;  %v437_v59 = vld [vmem:[#allocation2 + $0x60] sm:$0xff]  ;;  %v436_v60 = vld [vmem:[#allocation2 + $0x58] sm:$0xff]  ;;  %v435_v61 = vld [vmem:[#allocation2 + $0x50] sm:$0xff] }
  0x1a   :  { %1794 = vmatprep.subr.mxu1 %v2178_v0  ;;  %1824 = vmatprep.subr.mxu0 %v2178_v0  ;;  %v434_v62 = vld [vmem:[#allocation2 + $0x48] sm:$0xff]  ;;  %v433_v63 = vld [vmem:[#allocation2 + $0x40] sm:$0xff] }
  0x1b   :  { %1795 = vmatpush3.msra.mxu1 %v2271_v10  ;;  %1825 = vmatpush3.msra.mxu0 %v2228_v2 }
  0x1c   :  { %1796 = vmatprep.subr.mxu1 %v2178_v0  ;;  %1826 = vmatprep.subr.mxu0 %v2178_v0 }
  0x1d   :  { %1797 = vmatpush3.msra.mxu1 %v2281_v11  ;;  %1827 = vmatpush3.msra.mxu0 %v2238_v4 }
  0x1e   :  { %1798 = vmatprep.subr.mxu1 %v2178_v0  ;;  %1828 = vmatprep.subr.mxu0 %v2178_v0 }
  0x1f   :  { %1799 = vmatpush3.msra.mxu1 %v2290_v12  ;;  %1829 = vmatpush3.msra.mxu0 %v2252_v7 }
  0x20   :  { %1801 = vmatmul.mubr.f32.vlgmr.msra.gmra.mxu1 %v2178_v0  ;;  %1803 = vmatprep.subr.mxu1 %v2178_v0 }
  0x21   :  { %1804 = vmatpush3.msra.mxu1 %v2223_v1  ;;  %1819 = vmatprep.mubr.msk.f32.mxu1 %vm2179_vm0, %v2178_v0 }
  0x22   :  { %1805 = vmatprep.subr.mxu1 %v2178_v0  ;;  %1830 = vmatprep.subr.mxu0 %v2178_v0 }
  0x23   :  { %1806 = vmatpush3.msra.mxu1 %v2228_v2  ;;  %1831 = vmatpush3.msra.mxu0 %v2263_v9 }
  0x24   :  { %1807 = vmatprep.subr.mxu1 %v2178_v0  ;;  %1832 = vmatprep.subr.mxu0 %v2178_v0 }
  0x25   :  { %1808 = vmatpush3.msra.mxu1 %v2238_v4  ;;  %1833 = vmatpush3.msra.mxu0 %v2271_v10 }
  0x26   :  { %1809 = vmatprep.subr.mxu1 %v2178_v0  ;;  %1834 = vmatprep.subr.mxu0 %v2178_v0 }
  0x27   :  { %1810 = vmatpush3.msra.mxu1 %v2252_v7  ;;  %1835 = vmatpush3.msra.mxu0 %v2281_v11 }
  0x28   :  { %1811 = vmatprep.subr.mxu1 %v2178_v0  ;;  %1836 = vmatprep.subr.mxu0 %v2178_v0 }
  0x29   :  { %1812 = vmatpush3.msra.mxu1 %v2263_v9  ;;  %1837 = vmatpush3.msra.mxu0 %v2290_v12 }
  0x2a   :  { %1813 = vmatprep.subr.mxu1 %v2178_v0  ;;  %1860 = vmatprep.subr.mxu0 %v2178_v0 }
  0x2b   :  { %1814 = vmatpush3.msra.mxu1 %v2271_v10  ;;  %1761 = vmatmul.mubr.msk.f32.gmra.mxu0 %vm47_vm2, %v36_v13 }
  0x2c   :  { %1815 = vmatprep.subr.mxu1 %v2178_v0  ;;  %1763 = vmatprep.mubr.msk.f32.mxu0 %vm2179_vm0, %v2178_v0 }
  0x2d   :  { %1816 = vmatpush3.msra.mxu1 %v2281_v11 }
  0x2e   :  { %1817 = vmatprep.subr.mxu1 %v2178_v0 }
  0x2f   :  { %1818 = vmatpush3.msra.mxu1 %v2290_v12  ;;  %1764 = vmatmul.mubr.msk.f32.gmra.mxu0 %vm47_vm2, %v37_v14 }
  0x30   :  { %1841 = vmatprep.subr.mxu1 %v2178_v0  ;;  %1766 = vmatprep.mubr.msk.f32.mxu0 %vm2179_vm0, %v2178_v0 }
  0x33   :  { %1767 = vmatmul.mubr.msk.f32.gmra.mxu0 %vm47_vm2, %v38_v15 }
  0x34   :  { %1769 = vmatprep.mubr.msk.f32.mxu0 %vm2179_vm0, %v2178_v0 }
  0x37   :  { %1770 = vmatmul.mubr.msk.f32.gmra.mxu0 %vm47_vm2, %v39_v16  ;;  %v670_v16 = vld [vmem:[#allocation2 + $0xb8] sm:$0xff] }
  0x38   :  { %1772 = vmatprep.mubr.msk.f32.mxu0 %vm2179_vm0, %v2178_v0 }
  0x3b   :  { %1773 = vmatmul.mubr.msk.f32.gmra.mxu0 %vm47_vm2, %v40_v17  ;;  %v669_v17 = vld [vmem:[#allocation2 + $0xb0] sm:$0xff] }
  0x3c   :  { %1775 = vmatprep.mubr.msk.f32.mxu0 %vm2179_vm0, %v2178_v0 }
  0x3f   :  { %1776 = vmatmul.mubr.msk.f32.gmra.mxu0 %vm47_vm2, %v41_v26 }
  0x40   :  { %1778 = vmatprep.mubr.msk.f32.mxu0 %vm2179_vm0, %v2178_v0 }
  0x43   :  { %1779 = vmatmul.mubr.msk.f32.gmra.mxu0 %vm47_vm2, %v42_v27 }
  0x44   :  { %1781 = vmatprep.mubr.msk.f32.mxu0 %vm2179_vm0, %v2178_v0 }
  0x47   :  { %1782 = vmatmul.mubr.msk.f32.gmra.mxu0 %vm47_vm2, %v43_v28 }
  0x48   :  { %1838 = vmatprep.mubr.msk.f32.mxu0 %vm2179_vm0, %v2178_v0 }
  0xd6   :  { %v145_v18 = vpop.f32.mrf.mxu0 }
  0xd8   :  { %v1759_v19 = vpop.f32.mrf.mxu0 }
  0xd9   :  { %v667_v19 = vld [vmem:[#allocation2 + $0xa0] sm:$0xff] }
  0xe0   :  { %v267_v20 = vpop.f32.mrf.mxu1 }
  0xe1   :  { %v271_v21 = vadd.f32 %v267_v20, %v145_v18  ;;  %v668_v18 = vld [vmem:[#allocation2 + $0xa8] sm:$0xff]  ;;  %v666_v20 = vld [vmem:[#allocation2 + $0x98] sm:$0xff] }
  0xe2   :  { %v1802_v22 = vpop.f32.mrf.mxu1 }
  0xe3   :  { %2113 = vtanh.f32 %v271_v21  ;;  %v665_v21 = vld [vmem:[#allocation2 + $0x90] sm:$0xff]  ;;  %v664_v22 = vld [vmem:[#allocation2 + $0x88] sm:$0xff] }
  0xeb   :  { %v150_v24 = vpop.f32.mrf.mxu0 }
  0xed   :  { %v1762_v25 = vpop.f32.mrf.mxu0 }
  0xef   :  { %v2380_v29 = vpop.f32.mrf.mxu0 }
  0xf0   :  { %v2114_v23 = vpop.eup %2113 }
  0xf1   :  { %1820 = vmatmul.mubr.msk.f32.vlgmr.msra.gmra.mxu1 %vm197_vm3, %v2114_v23  ;;  %v1765_v30 = vpop.f32.mrf.mxu0  ;;  %v663_v23 = vld [vmem:[#allocation2 + $0x80] sm:$0xff] }
  0xf2   :  { %1857 = vmatprep.mubr.msk.f32.mxu1 %vm2179_vm0, %v2178_v0  ;;  %1842 = vmatpush3.msra.mxu1 %v440_v56  ;;  %v982_v56 = vld [vmem:[#allocation2 + $0x118] sm:$0xff] }
  0xf3   :  { %v2382_v31 = vpop.f32.mrf.mxu0  ;;  %1843 = vmatprep.subr.mxu1 %v2178_v0 }
  0xf4   :  { %1844 = vmatpush3.msra.mxu1 %v439_v57  ;;  %v981_v57 = vld [vmem:[#allocation2 + $0x110] sm:$0xff] }
  0xf5   :  { %v1768_v32 = vpop.f32.mrf.mxu0  ;;  %1845 = vmatprep.subr.mxu1 %v2178_v0 }
  0xf6   :  { %1846 = vmatpush3.msra.mxu1 %v438_v58  ;;  %v827_v32 = vld [vmem:[#allocation2 + $0xf0] sm:$0xff]  ;;  %v980_v58 = vld [vmem:[#allocation2 + $0x108] sm:$0xff] }
  0xf7   :  { %v2384_v33 = vpop.f32.mrf.mxu0  ;;  %1847 = vmatprep.subr.mxu1 %v2178_v0 }
  0xf8   :  { %1848 = vmatpush3.msra.mxu1 %v437_v59  ;;  %v979_v59 = vld [vmem:[#allocation2 + $0x100] sm:$0xff] }
  0xf9   :  { %v1771_v34 = vpop.f32.mrf.mxu0  ;;  %1849 = vmatprep.subr.mxu1 %v2178_v0 }
  0xfa   :  { %1850 = vmatpush3.msra.mxu1 %v436_v60  ;;  %v826_v34 = vld [vmem:[#allocation2 + $0xe8] sm:$0xff] }
  0xfb   :  { %v2386_v35 = vpop.f32.mrf.mxu0  ;;  %1851 = vmatprep.subr.mxu1 %v2178_v0 }
  0xfc   :  { %1852 = vmatpush3.msra.mxu1 %v435_v61 }
  0xfd   :  { %v1774_v36 = vpop.f32.mrf.mxu0  ;;  %1853 = vmatprep.subr.mxu1 %v2178_v0 }
  0xfe   :  { %1854 = vmatpush3.msra.mxu1 %v434_v62  ;;  %v825_v36 = vld [vmem:[#allocation2 + $0xe0] sm:$0xff] }
  0xff   :  { %v2402_v50 = vpop.f32.mrf.mxu0  ;;  %1855 = vmatprep.subr.mxu1 %v2178_v0 }
 0x100   :  { %1856 = vmatpush3.msra.mxu1 %v433_v63 }
 0x101   :  { %v1777_v51 = vpop.f32.mrf.mxu0  ;;  %1879 = vmatprep.subr.mxu1 %v2178_v0 }
 0x102   :  { %v985_v51 = vld [vmem:[#allocation2 + $0x130] sm:$0xff] }
 0x103   :  { %v2404_v52 = vpop.f32.mrf.mxu0 }
 0x105   :  { %v1780_v53 = vpop.f32.mrf.mxu0 }
 0x106   :  { %v984_v53 = vld [vmem:[#allocation2 + $0x128] sm:$0xff] }
 0x107   :  { %v2406_v54 = vpop.f32.mrf.mxu0 }
 0x109   :  { %v1783_v55 = vpop.f32.mrf.mxu0 }
 0x10a   :  { %v983_v55 = vld [vmem:[#allocation2 + $0x120] sm:$0xff] }
 0x1b1   :  { %v342_v37 = vpop.f32.mrf.mxu1 }
 0x1b2   :  { %v346_v38 = vadd.f32 %v342_v37, %v150_v24  ;;  %v824_v37 = vld [vmem:[#allocation2 + $0xd8] sm:$0xff] }
 0x1b3   :  { %v1821_v39 = vpop.f32.mrf.mxu1 }
 0x1b4   :  { %2115 = vtanh.f32 %v346_v38  ;;  %v823_v38 = vld [vmem:[#allocation2 + $0xd0] sm:$0xff]  ;;  %v822_v39 = vld [vmem:[#allocation2 + $0xc8] sm:$0xff] }
 0x1c1   :  { %v2116_v41 = vpop.eup %2115 }
 0x1c2   :  { %1839 = vmatmul.mubr.msk.f32.vlgmr.msra.gmra.mxu0 %vm197_vm3, %v2116_v41  ;;  %v348_v49 = vmax.f32 %v2116_v41, 0.0 }
 0x1c3   :  { %1861 = vmatpush3.msra.mxu0 %v356_v40  ;;  %1876 = vmatprep.mubr.msk.f32.mxu0 %vm2179_vm0, %v2178_v0  ;;  %v821_v40 = vld [vmem:[#allocation2 + $0xc0] sm:$0xff] }
 0x1c4   :  { %1862 = vmatprep.subr.mxu0 %v2178_v0 }
 0x1c5   :  { %1863 = vmatpush3.msra.mxu0 %v355_v42 }
 0x1c6   :  { %1864 = vmatprep.subr.mxu0 %v2178_v0 }
 0x1c7   :  { %1865 = vmatpush3.msra.mxu0 %v354_v43 }
 0x1c8   :  { %1866 = vmatprep.subr.mxu0 %v2178_v0 }
 0x1c9   :  { %1867 = vmatpush3.msra.mxu0 %v353_v44 }
 0x1ca   :  { %1868 = vmatprep.subr.mxu0 %v2178_v0 }
 0x1cb   :  { %1869 = vmatpush3.msra.mxu0 %v352_v45 }
 0x1cc   :  { %1870 = vmatprep.subr.mxu0 %v2178_v0 }
 0x1cd   :  { %1871 = vmatpush3.msra.mxu0 %v351_v46 }
 0x1ce   :  { %1872 = vmatprep.subr.mxu0 %v2178_v0 }
 0x1cf   :  { %1873 = vmatpush3.msra.mxu0 %v350_v47 }
 0x1d0   :  { %1874 = vmatprep.subr.mxu0 %v2178_v0 }
 0x1d1   :  { %1875 = vmatpush3.msra.mxu0 %v349_v48 }
 0x1d2   :  { %1877 = vmatmul.mubr.msk.f32.vlgmr.msra.gmra.mxu0 %vm197_vm3, %v348_v49  ;;  %1898 = vmatprep.subr.mxu0 %v2178_v0 }
 0x1d3   :  { %1914 = vmatprep.mubr.msk.f32.mxu0 %vm2179_vm0, %v2178_v0  ;;  %1899 = vmatpush3.msra.mxu0 %v670_v16  ;;  %v1140_v16 = vld [vmem:[#allocation2 + $0x158] sm:$0xff] }
 0x1d4   :  { %1900 = vmatprep.subr.mxu0 %v2178_v0 }
 0x1d5   :  { %1901 = vmatpush3.msra.mxu0 %v669_v17  ;;  %v1139_v17 = vld [vmem:[#allocation2 + $0x150] sm:$0xff] }
 0x1d6   :  { %1902 = vmatprep.subr.mxu0 %v2178_v0 }
 0x1d7   :  { %1903 = vmatpush3.msra.mxu0 %v668_v18  ;;  %v1138_v18 = vld [vmem:[#allocation2 + $0x148] sm:$0xff] }
 0x1d8   :  { %1904 = vmatprep.subr.mxu0 %v2178_v0 }
 0x1d9   :  { %1905 = vmatpush3.msra.mxu0 %v667_v19  ;;  %v1137_v19 = vld [vmem:[#allocation2 + $0x140] sm:$0xff] }
 0x1da   :  { %1906 = vmatprep.subr.mxu0 %v2178_v0 }
 0x1db   :  { %1907 = vmatpush3.msra.mxu0 %v666_v20 }
 0x1dc   :  { %1908 = vmatprep.subr.mxu0 %v2178_v0 }
 0x1dd   :  { %1909 = vmatpush3.msra.mxu0 %v665_v21 }
 0x1de   :  { %1910 = vmatprep.subr.mxu0 %v2178_v0 }
 0x1df   :  { %1911 = vmatpush3.msra.mxu0 %v664_v22 }
 0x1e0   :  { %1912 = vmatprep.subr.mxu0 %v2178_v0 }
 0x1e1   :  { %1913 = vmatpush3.msra.mxu0 %v663_v23 }
 0x1e2   :  { %1936 = vmatprep.subr.mxu0 %v2178_v0 }
 0x282   :  { %v426_v3 = vpop.f32.mrf.mxu0 }
 0x283   :  { %v430_v5 = vadd.f32 %v426_v3, %v2380_v29 }
 0x284   :  { %v1840_v6 = vpop.f32.mrf.mxu0 }
 0x285   :  { %2117 = vtanh.f32 %v430_v5 }
 0x292   :  { %v2118_v8 = vpop.eup %2117  ;;  %v2417_v13 = vpop.f32.mrf.mxu0 }
 0x293   :  { %v432_v14 = vmax.f32 %v2118_v8, 0.0 }
 0x294   :  { %v1878_v15 = vpop.f32.mrf.mxu0 }
 0x295   :  { %1858 = vmatmul.mubr.msk.f32.vlgmr.msra.gmra.mxu1 %vm197_vm3, %v432_v14  ;;  %v1142_v14 = vld [vmem:[#allocation2 + $0x168] sm:$0xff]  ;;  %v1141_v15 = vld [vmem:[#allocation2 + $0x160] sm:$0xff] }
 0x296   :  { %1880 = vmatpush3.msra.mxu1 %v2223_v1  ;;  %1895 = vmatprep.mubr.msk.f32.mxu1 %vm2179_vm0, %v2178_v0 }
 0x297   :  { %1881 = vmatprep.subr.mxu1 %v2178_v0 }
 0x298   :  { %1882 = vmatpush3.msra.mxu1 %v2228_v2 }
 0x299   :  { %1883 = vmatprep.subr.mxu1 %v2178_v0 }
 0x29a   :  { %1884 = vmatpush3.msra.mxu1 %v2238_v4 }
 0x29b   :  { %1885 = vmatprep.subr.mxu1 %v2178_v0 }
 0x29c   :  { %1886 = vmatpush3.msra.mxu1 %v2252_v7 }
 0x29d   :  { %1887 = vmatprep.subr.mxu1 %v2178_v0 }
 0x29e   :  { %1888 = vmatpush3.msra.mxu1 %v2263_v9 }
 0x29f   :  { %1889 = vmatprep.subr.mxu1 %v2178_v0 }
 0x2a0   :  { %1890 = vmatpush3.msra.mxu1 %v2271_v10 }
 0x2a1   :  { %1891 = vmatprep.subr.mxu1 %v2178_v0 }
 0x2a2   :  { %1892 = vmatpush3.msra.mxu1 %v2281_v11 }
 0x2a3   :  { %1893 = vmatprep.subr.mxu1 %v2178_v0 }
 0x2a4   :  { %1894 = vmatpush3.msra.mxu1 %v2290_v12 }
 0x2a5   :  { %1896 = vmatmul.mubr.msk.f32.vlgmr.msra.gmra.mxu1 %vm197_vm3, %v2118_v8  ;;  %1917 = vmatprep.subr.mxu1 %v2178_v0 }
 0x2a6   :  { %1918 = vmatpush3.msra.mxu1 %v2223_v1  ;;  %1933 = vmatprep.mubr.msk.f32.mxu1 %vm2179_vm0, %v2178_v0 }
 0x2a7   :  { %1919 = vmatprep.subr.mxu1 %v2178_v0 }
 0x2a8   :  { %1920 = vmatpush3.msra.mxu1 %v2228_v2 }
 0x2a9   :  { %1921 = vmatprep.subr.mxu1 %v2178_v0 }
 0x2aa   :  { %1922 = vmatpush3.msra.mxu1 %v2238_v4 }
 0x2ab   :  { %1923 = vmatprep.subr.mxu1 %v2178_v0 }
 0x2ac   :  { %1924 = vmatpush3.msra.mxu1 %v2252_v7 }
 0x2ad   :  { %1925 = vmatprep.subr.mxu1 %v2178_v0 }
 0x2ae   :  { %1926 = vmatpush3.msra.mxu1 %v2263_v9 }
 0x2af   :  { %1927 = vmatprep.subr.mxu1 %v2178_v0 }
 0x2b0   :  { %1928 = vmatpush3.msra.mxu1 %v2271_v10 }
 0x2b1   :  { %1929 = vmatprep.subr.mxu1 %v2178_v0 }
 0x2b2   :  { %1930 = vmatpush3.msra.mxu1 %v2281_v11 }
 0x2b3   :  { %1931 = vmatprep.subr.mxu1 %v2178_v0 }
 0x2b4   :  { %1932 = vmatpush3.msra.mxu1 %v2290_v12 }
 0x2b5   :  { %1955 = vmatprep.subr.mxu1 %v2178_v0 }
 0x355   :  { %v510_v24 = vpop.f32.mrf.mxu1 }
 0x356   :  { %v584_v42 = vadd.f32 %v2417_v13, %v510_v24  ;;  %v1143_v13 = vld [vmem:[#allocation2 + $0x170] sm:$0xff] }
 0x357   :  { %v1859_v25 = vpop.f32.mrf.mxu1 }
 0x365   :  { %v656_v26 = vpop.f32.mrf.mxu1 }
 0x366   :  { %v660_v27 = vadd.f32 %v656_v26, %v2382_v31  ;;  %v828_v31 = vld [vmem:[#allocation2 + $0xf8] sm:$0xff] }
 0x367   :  { %v1897_v28 = vpop.f32.mrf.mxu1 }
 0x368   :  { %2119 = vtanh.f32 %v660_v27 }
 0x375   :  { %v2120_v29 = vpop.eup %2119 }
 0x376   :  { %1934 = vmatmul.mubr.msk.f32.vlgmr.msra.gmra.mxu1 %vm197_vm3, %v2120_v29  ;;  %v662_v30 = vmax.f32 %v2120_v29, 0.0 }
 0x377   :  { %1956 = vmatpush3.msra.mxu1 %v2223_v1  ;;  %1971 = vmatprep.mubr.msk.f32.mxu1 %vm2179_vm0, %v2178_v0 }
 0x378   :  { %1915 = vmatmul.mubr.msk.f32.vlgmr.msra.gmra.mxu0 %vm197_vm3, %v662_v30  ;;  %1957 = vmatprep.subr.mxu1 %v2178_v0 }
 0x379   :  { %1958 = vmatpush3.msra.mxu1 %v2228_v2  ;;  %1952 = vmatprep.mubr.msk.f32.mxu0 %vm2179_vm0, %v2178_v0 }
 0x37a   :  { %1959 = vmatprep.subr.mxu1 %v2178_v0  ;;  %1937 = vmatpush3.msra.mxu0 %v828_v31 }
 0x37b   :  { %1960 = vmatpush3.msra.mxu1 %v2238_v4  ;;  %1938 = vmatprep.subr.mxu0 %v2178_v0 }
 0x37c   :  { %1961 = vmatprep.subr.mxu1 %v2178_v0  ;;  %1939 = vmatpush3.msra.mxu0 %v827_v32 }
 0x37d   :  { %1962 = vmatpush3.msra.mxu1 %v2252_v7  ;;  %1940 = vmatprep.subr.mxu0 %v2178_v0 }
 0x37e   :  { %1963 = vmatprep.subr.mxu1 %v2178_v0  ;;  %1941 = vmatpush3.msra.mxu0 %v826_v34 }
 0x37f   :  { %1964 = vmatpush3.msra.mxu1 %v2263_v9  ;;  %1942 = vmatprep.subr.mxu0 %v2178_v0 }
 0x380   :  { %1965 = vmatprep.subr.mxu1 %v2178_v0  ;;  %1943 = vmatpush3.msra.mxu0 %v825_v36 }
 0x381   :  { %1966 = vmatpush3.msra.mxu1 %v2271_v10  ;;  %1944 = vmatprep.subr.mxu0 %v2178_v0 }
 0x382   :  { %1967 = vmatprep.subr.mxu1 %v2178_v0  ;;  %1945 = vmatpush3.msra.mxu0 %v824_v37  ;;  %v1460_v37 = vld [vmem:[#allocation2 + $0x1f8] sm:$0xff] }
 0x383   :  { %1968 = vmatpush3.msra.mxu1 %v2281_v11  ;;  %1946 = vmatprep.subr.mxu0 %v2178_v0 }
 0x384   :  { %1969 = vmatprep.subr.mxu1 %v2178_v0  ;;  %1947 = vmatpush3.msra.mxu0 %v823_v38  ;;  %v1459_v38 = vld [vmem:[#allocation2 + $0x1f0] sm:$0xff] }
 0x385   :  { %1970 = vmatpush3.msra.mxu1 %v2290_v12  ;;  %1948 = vmatprep.subr.mxu0 %v2178_v0 }
 0x386   :  { %1993 = vmatprep.subr.mxu1 %v2178_v0  ;;  %1949 = vmatpush3.msra.mxu0 %v822_v39  ;;  %v1457_v39 = vld [vmem:[#allocation2 + $0x1e0] sm:$0xff] }
 0x387   :  { %1950 = vmatprep.subr.mxu0 %v2178_v0 }
 0x388   :  { %1951 = vmatpush3.msra.mxu0 %v821_v40  ;;  %v1456_v40 = vld [vmem:[#allocation2 + $0x1d8] sm:$0xff] }
 0x389   :  { %1974 = vmatprep.subr.mxu0 %v2178_v0 }
 0x436   :  { %v814_v41 = vpop.f32.mrf.mxu1 }
 0x437   :  { %v818_v43 = vadd.f32 %v814_v41, %v2384_v33  ;;  %v986_v33 = vld [vmem:[#allocation2 + $0x138] sm:$0xff]  ;;  %v1455_v41 = vld [vmem:[#allocation2 + $0x1d0] sm:$0xff] }
 0x438   :  { %v740_v44 = vpop.f32.mrf.mxu0  ;;  %v1935_v45 = vpop.f32.mrf.mxu1 }
 0x439   :  { %2121 = vtanh.f32 %v818_v43  ;;  %v744_v46 = vadd.f32 %v740_v44, %v584_v42  ;;  %v1454_v42 = vld [vmem:[#allocation2 + $0x1c8] sm:$0xff]  ;;  %v1453_v43 = vld [vmem:[#allocation2 + $0x1c0] sm:$0xff] }
 0x43a   :  { %v1916_v47 = vpop.f32.mrf.mxu0 }
 0x446   :  { %v2122_v48 = vpop.eup %2121 }
 0x447   :  { %1972 = vmatmul.mubr.msk.f32.vlgmr.msra.gmra.mxu1 %vm197_vm3, %v2122_v48  ;;  %v820_v49 = vmax.f32 %v2122_v48, 0.0 }
 0x448   :  { %1994 = vmatpush3.msra.mxu1 %v2223_v1  ;;  %2009 = vmatprep.mubr.msk.f32.mxu1 %vm2179_vm0, %v2178_v0 }
 0x449   :  { %1953 = vmatmul.mubr.msk.f32.vlgmr.msra.gmra.mxu0 %vm197_vm3, %v820_v49  ;;  %1995 = vmatprep.subr.mxu1 %v2178_v0 }
 0x44a   :  { %1996 = vmatpush3.msra.mxu1 %v2228_v2  ;;  %1990 = vmatprep.mubr.msk.f32.mxu0 %vm2179_vm0, %v2178_v0 }
 0x44b   :  { %1997 = vmatprep.subr.mxu1 %v2178_v0  ;;  %1975 = vmatpush3.msra.mxu0 %v986_v33 }
 0x44c   :  { %1998 = vmatpush3.msra.mxu1 %v2238_v4  ;;  %1976 = vmatprep.subr.mxu0 %v2178_v0 }
 0x44d   :  { %1999 = vmatprep.subr.mxu1 %v2178_v0  ;;  %1977 = vmatpush3.msra.mxu0 %v985_v51 }
 0x44e   :  { %2000 = vmatpush3.msra.mxu1 %v2252_v7  ;;  %1978 = vmatprep.subr.mxu0 %v2178_v0 }
 0x44f   :  { %2001 = vmatprep.subr.mxu1 %v2178_v0  ;;  %1979 = vmatpush3.msra.mxu0 %v984_v53 }
 0x450   :  { %2002 = vmatpush3.msra.mxu1 %v2263_v9  ;;  %1980 = vmatprep.subr.mxu0 %v2178_v0 }
 0x451   :  { %2003 = vmatprep.subr.mxu1 %v2178_v0  ;;  %1981 = vmatpush3.msra.mxu0 %v983_v55  ;;  %v1585_v55 = vld [vmem:[%s2613_s4] ss:$0 sm:$0xff] }
 0x452   :  { %2004 = vmatpush3.msra.mxu1 %v2271_v10  ;;  %1982 = vmatprep.subr.mxu0 %v2178_v0 }
 0x453   :  { %2005 = vmatprep.subr.mxu1 %v2178_v0  ;;  %1983 = vmatpush3.msra.mxu0 %v982_v56 }
 0x454   :  { %2006 = vmatpush3.msra.mxu1 %v2281_v11  ;;  %1984 = vmatprep.subr.mxu0 %v2178_v0 }
 0x455   :  { %2007 = vmatprep.subr.mxu1 %v2178_v0  ;;  %1985 = vmatpush3.msra.mxu0 %v981_v57 }
 0x456   :  { %2008 = vmatpush3.msra.mxu1 %v2290_v12  ;;  %1986 = vmatprep.subr.mxu0 %v2178_v0 }
 0x457   :  { %2031 = vmatprep.subr.mxu1 %v2178_v0  ;;  %1987 = vmatpush3.msra.mxu0 %v980_v58 }
 0x458   :  { %1988 = vmatprep.subr.mxu0 %v2178_v0 }
 0x459   :  { %1989 = vmatpush3.msra.mxu0 %v979_v59 }
 0x45a   :  { %2012 = vmatprep.subr.mxu0 %v2178_v0 }
 0x507   :  { %v972_v60 = vpop.f32.mrf.mxu1 }
 0x508   :  { %v976_v61 = vadd.f32 %v972_v60, %v2386_v35  ;;  %v1144_v35 = vld [vmem:[#allocation2 + $0x178] sm:$0xff] }
 0x509   :  { %v898_v62 = vpop.f32.mrf.mxu0  ;;  %v1973_v63 = vpop.f32.mrf.mxu1 }
 0x50a   :  { %2123 = vtanh.f32 %v976_v61  ;;  %v902_v3 = vadd.f32 %v898_v62, %v744_v46 }
 0x50b   :  { %v1954_v5 = vpop.f32.mrf.mxu0 }
 0x517   :  { %v2124_v6 = vpop.eup %2123 }
 0x518   :  { %2010 = vmatmul.mubr.msk.f32.vlgmr.msra.gmra.mxu1 %vm197_vm3, %v2124_v6  ;;  %v978_v8 = vmax.f32 %v2124_v6, 0.0 }
 0x519   :  { %2032 = vmatpush3.msra.mxu1 %v2223_v1  ;;  %2047 = vmatprep.mubr.msk.f32.mxu1 %vm2179_vm0, %v2178_v0 }
 0x51a   :  { %1991 = vmatmul.mubr.msk.f32.vlgmr.msra.gmra.mxu0 %vm197_vm3, %v978_v8  ;;  %2033 = vmatprep.subr.mxu1 %v2178_v0 }
 0x51b   :  { %2034 = vmatpush3.msra.mxu1 %v2228_v2  ;;  %2028 = vmatprep.mubr.msk.f32.mxu0 %vm2179_vm0, %v2178_v0 }
 0x51c   :  { %2035 = vmatprep.subr.mxu1 %v2178_v0  ;;  %2013 = vmatpush3.msra.mxu0 %v1144_v35 }
 0x51d   :  { %2036 = vmatpush3.msra.mxu1 %v2238_v4  ;;  %2014 = vmatprep.subr.mxu0 %v2178_v0 }
 0x51e   :  { %2037 = vmatprep.subr.mxu1 %v2178_v0  ;;  %2015 = vmatpush3.msra.mxu0 %v1143_v13 }
 0x51f   :  { %2038 = vmatpush3.msra.mxu1 %v2252_v7  ;;  %2016 = vmatprep.subr.mxu0 %v2178_v0 }
 0x520   :  { %2039 = vmatprep.subr.mxu1 %v2178_v0  ;;  %2017 = vmatpush3.msra.mxu0 %v1142_v14 }
 0x521   :  { %2040 = vmatpush3.msra.mxu1 %v2263_v9  ;;  %2018 = vmatprep.subr.mxu0 %v2178_v0 }
 0x522   :  { %2041 = vmatprep.subr.mxu1 %v2178_v0  ;;  %2019 = vmatpush3.msra.mxu0 %v1141_v15 }
 0x523   :  { %2042 = vmatpush3.msra.mxu1 %v2271_v10  ;;  %2020 = vmatprep.subr.mxu0 %v2178_v0 }
 0x524   :  { %2043 = vmatprep.subr.mxu1 %v2178_v0  ;;  %2021 = vmatpush3.msra.mxu0 %v1140_v16 }
 0x525   :  { %2044 = vmatpush3.msra.mxu1 %v2281_v11  ;;  %2022 = vmatprep.subr.mxu0 %v2178_v0 }
 0x526   :  { %2045 = vmatprep.subr.mxu1 %v2178_v0  ;;  %2023 = vmatpush3.msra.mxu0 %v1139_v17 }
 0x527   :  { %2046 = vmatpush3.msra.mxu1 %v2290_v12  ;;  %2024 = vmatprep.subr.mxu0 %v2178_v0 }
 0x528   :  { %2069 = vmatprep.subr.mxu1 %v2178_v0  ;;  %2025 = vmatpush3.msra.mxu0 %v1138_v18 }
 0x529   :  { %2026 = vmatprep.subr.mxu0 %v2178_v0 }
 0x52a   :  { %2027 = vmatpush3.msra.mxu0 %v1137_v19 }
 0x52b   :  { %2050 = vmatprep.subr.mxu0 %v2178_v0 }
 0x5d8   :  { %v1130_v20 = vpop.f32.mrf.mxu1 }
 0x5d9   :  { %v1134_v21 = vadd.f32 %v1130_v20, %v2402_v50 }
 0x5da   :  { %v1056_v22 = vpop.f32.mrf.mxu0  ;;  %v2011_v23 = vpop.f32.mrf.mxu1 }
 0x5db   :  { %2125 = vtanh.f32 %v1134_v21  ;;  %v1060_v24 = vadd.f32 %v1056_v22, %v902_v3 }
 0x5dc   :  { %v1992_v25 = vpop.f32.mrf.mxu0 }
 0x5e8   :  { %v2126_v26 = vpop.eup %2125 }
 0x5e9   :  { %2048 = vmatmul.mubr.msk.f32.vlgmr.msra.gmra.mxu1 %vm197_vm3, %v2126_v26  ;;  %v1136_v27 = vmax.f32 %v2126_v26, 0.0 }
 0x5ea   :  { %2070 = vmatpush3.msra.mxu1 %v2223_v1  ;;  %2085 = vmatprep.mubr.msk.f32.mxu1 %vm2179_vm0, %v2178_v0  ;;  %v1302_v1 = vld [vmem:[#allocation2 + $0x1b8] sm:$0xff] }
 0x5eb   :  { %2029 = vmatmul.mubr.msk.f32.vlgmr.msra.gmra.mxu0 %vm197_vm3, %v1136_v27  ;;  %2071 = vmatprep.subr.mxu1 %v2178_v0 }
 0x5ec   :  { %2072 = vmatpush3.msra.mxu1 %v2228_v2  ;;  %2066 = vmatprep.mubr.msk.f32.mxu0 %vm2179_vm0, %v2178_v0  ;;  %v1301_v2 = vld [vmem:[#allocation2 + $0x1b0] sm:$0xff] }
 0x5ed   :  { %2073 = vmatprep.subr.mxu1 %v2178_v0  ;;  %2051 = vmatpush3.msra.mxu0 %v1302_v1 }
 0x5ee   :  { %2074 = vmatpush3.msra.mxu1 %v2238_v4  ;;  %2052 = vmatprep.subr.mxu0 %v2178_v0  ;;  %v1300_v4 = vld [vmem:[#allocation2 + $0x1a8] sm:$0xff] }
 0x5ef   :  { %2075 = vmatprep.subr.mxu1 %v2178_v0  ;;  %2053 = vmatpush3.msra.mxu0 %v1301_v2 }
 0x5f0   :  { %2076 = vmatpush3.msra.mxu1 %v2252_v7  ;;  %2054 = vmatprep.subr.mxu0 %v2178_v0  ;;  %v1299_v7 = vld [vmem:[#allocation2 + $0x1a0] sm:$0xff] }
 0x5f1   :  { %2077 = vmatprep.subr.mxu1 %v2178_v0  ;;  %2055 = vmatpush3.msra.mxu0 %v1300_v4 }
 0x5f2   :  { %2078 = vmatpush3.msra.mxu1 %v2263_v9  ;;  %2056 = vmatprep.subr.mxu0 %v2178_v0  ;;  %v1298_v9 = vld [vmem:[#allocation2 + $0x198] sm:$0xff] }
 0x5f3   :  { %2079 = vmatprep.subr.mxu1 %v2178_v0  ;;  %2057 = vmatpush3.msra.mxu0 %v1299_v7 }
 0x5f4   :  { %2080 = vmatpush3.msra.mxu1 %v2271_v10  ;;  %2058 = vmatprep.subr.mxu0 %v2178_v0  ;;  %v1297_v10 = vld [vmem:[#allocation2 + $0x190] sm:$0xff] }
 0x5f5   :  { %2081 = vmatprep.subr.mxu1 %v2178_v0  ;;  %2059 = vmatpush3.msra.mxu0 %v1298_v9 }
 0x5f6   :  { %2082 = vmatpush3.msra.mxu1 %v2281_v11  ;;  %2060 = vmatprep.subr.mxu0 %v2178_v0  ;;  %v1296_v11 = vld [vmem:[#allocation2 + $0x188] sm:$0xff] }
 0x5f7   :  { %2083 = vmatprep.subr.mxu1 %v2178_v0  ;;  %2061 = vmatpush3.msra.mxu0 %v1297_v10 }
 0x5f8   :  { %2084 = vmatpush3.msra.mxu1 %v2290_v12  ;;  %2062 = vmatprep.subr.mxu0 %v2178_v0  ;;  %v1295_v12 = vld [vmem:[#allocation2 + $0x180] sm:$0xff] }
 0x5f9   :  { %2063 = vmatpush3.msra.mxu0 %v1296_v11 }
 0x5fa   :  { %2064 = vmatprep.subr.mxu0 %v2178_v0 }
 0x5fb   :  { %2065 = vmatpush3.msra.mxu0 %v1295_v12 }
 0x5fc   :  { %2088 = vmatprep.subr.mxu0 %v2178_v0 }
 0x6a9   :  { %v1288_v50 = vpop.f32.mrf.mxu1 }
 0x6aa   :  { %v1292_v28 = vadd.f32 %v1288_v50, %v2404_v52  ;;  %v1458_v52 = vld [vmem:[#allocation2 + $0x1e8] sm:$0xff] }
 0x6ab   :  { %v1214_v29 = vpop.f32.mrf.mxu0  ;;  %v2049_v30 = vpop.f32.mrf.mxu1 }
 0x6ac   :  { %2127 = vtanh.f32 %v1292_v28  ;;  %v1218_v31 = vadd.f32 %v1214_v29, %v1060_v24 }
 0x6ad   :  { %v2030_v32 = vpop.f32.mrf.mxu0 }
 0x6b9   :  { %v2128_v34 = vpop.eup %2127 }
 0x6ba   :  { %2086 = vmatmul.mubr.msk.f32.vlgmr.msra.gmra.mxu1 %vm197_vm3, %v2128_v34  ;;  %v1294_v36 = vmax.f32 %v2128_v34, 0.0 }
 0x6bc   :  { %2067 = vmatmul.mubr.msk.f32.vlgmr.msra.gmra.mxu0 %vm197_vm3, %v1294_v36 }
 0x6bd   :  { %2104 = vmatprep.mubr.msk.f32.mxu0 %vm2179_vm0, %v2178_v0  ;;  %2089 = vmatpush3.msra.mxu0 %v1460_v37 }
 0x6be   :  { %2090 = vmatprep.subr.mxu0 %v2178_v0 }
 0x6bf   :  { %2091 = vmatpush3.msra.mxu0 %v1459_v38 }
 0x6c0   :  { %2092 = vmatprep.subr.mxu0 %v2178_v0 }
 0x6c1   :  { %2093 = vmatpush3.msra.mxu0 %v1458_v52 }
 0x6c2   :  { %2094 = vmatprep.subr.mxu0 %v2178_v0 }
 0x6c3   :  { %2095 = vmatpush3.msra.mxu0 %v1457_v39 }
 0x6c4   :  { %2096 = vmatprep.subr.mxu0 %v2178_v0 }
 0x6c5   :  { %2097 = vmatpush3.msra.mxu0 %v1456_v40 }
 0x6c6   :  { %2098 = vmatprep.subr.mxu0 %v2178_v0 }
 0x6c7   :  { %2099 = vmatpush3.msra.mxu0 %v1455_v41 }
 0x6c8   :  { %2100 = vmatprep.subr.mxu0 %v2178_v0 }
 0x6c9   :  { %2101 = vmatpush3.msra.mxu0 %v1454_v42 }
 0x6ca   :  { %2102 = vmatprep.subr.mxu0 %v2178_v0 }
 0x6cb   :  { %2103 = vmatpush3.msra.mxu0 %v1453_v43 }
 0x77a   :  { %v1446_v44 = vpop.f32.mrf.mxu1 }
 0x77b   :  { %v1450_v45 = vadd.f32 %v1446_v44, %v2406_v54 }
 0x77c   :  { %v1372_v46 = vpop.f32.mrf.mxu0  ;;  %v2087_v47 = vpop.f32.mrf.mxu1 }
 0x77d   :  { %2129 = vtanh.f32 %v1450_v45  ;;  %v1376_v48 = vadd.f32 %v1372_v46, %v1218_v31 }
 0x77e   :  { %v2068_v49 = vpop.f32.mrf.mxu0 }
 0x78a   :  { %v2130_v33 = vpop.eup %2129 }
 0x78b   :  { %v1452_v51 = vmax.f32 %v2130_v33, 0.0 }
 0x78d   :  { %2105 = vmatmul.mubr.msk.f32.vlgmr.msra.gmra.mxu0 %vm197_vm3, %v1452_v51 }
 0x84d   :  { %v1530_v53 = vpop.f32.mrf.mxu0 }
 0x84e   :  { %v1534_v0 = vadd.f32 %v1530_v53, %v1376_v48 }
 0x84f   :  { %v2106_v56 = vpop.f32.mrf.mxu0 }
 0x850   :  { %v1542_v57 = vadd.f32 %v1585_v55, %v1534_v0 }
 0x852   :  { %1543 = vst [vmem:[#allocation5] sm:$0xff] %v1542_v57 }
 0x853   :  { %2162 = shalt.err (!%p2159_p9)
}
 0x854   :  { %1553 = dma.vmem_to_hbm [thread:$0]  %s1551_s13, 128, %s2614_s5, [#allocation4]  }
 0x855   :  { %2173 = dma.done.wait [#allocation4], 128  }
 0x856   :  { %2174 = vsyncadd [#allocation4], 4294967168 }
 0x857   :  { %1557 = vsyncpa [#allocation3], 1 }
 0x858   :  { %1558 = vsyncpa [#allocation4], 1 }

</bundles_post_ra>
